<compile_context>
chip_gen: v7x
topology: tpu7x:2x2x1
jax: 0.10.0
libtpu: 0.0.40
codegen_flags: <defaults>
</compile_context>

<pallas_src>
import functools

import jax
import jax.numpy as jnp
from jax.experimental import pallas as pl
from jax.experimental.pallas import tpu as pltpu


_TARGET_BLOCK_BYTES = 2 * 1024 * 1024     # ~2 MiB x-block: >=85% of HBM roofline
_MIN_PALLAS_ELEMENTS = 1 << 18            # below this, XLA's fusion beats a pallas_call
_VMEM_LIMIT_BYTES = 32 * 1024 * 1024      # lift v5e's 16 MiB scoped default; safe on v7x


# ----------------------------------------------------------------------------
# Kernel: the entire PriceConstraintLayer.forward fused into one VMEM pass.
# ----------------------------------------------------------------------------
def _price_constraint_kernel(x_ref, lc_ref, o_ref, *, max_change_percent):
    x = x_ref[...]                                 # (tr, W)
    lc = lc_ref[...]                               # (tr, W) or (tr, 1)
    if lc.shape != x.shape:                        # splat the (tr, 1) column ONCE, reuse
        lc = jnp.broadcast_to(lc, x.shape)

    # Guard against zero/garbage lc in the masked lanes of a partial last block.
    lc_safe = jnp.where(lc == 0.0, 1.0, lc)
    inv_scale = 1.0 / (lc_safe * 0.01)             # one reciprocal, reused for both "/"

    # sigmoid(z) == 0.5 * (1 + tanh(z/2)): one EUP push instead of exp + reciprocal.
    z = jnp.abs(x - lc) * inv_scale
    confidence = 0.5 * (1.0 + jnp.tanh(0.5 * z))
    effective = max_change_percent * (1.0 + confidence)
    delta = lc * effective                         # reused for both bounds
    max_price = lc + delta
    min_price = lc - delta

    # The reference's two clamps are mutually exclusive (max_price > min_price, and the
    # upper-clamp output >= max_price), so fold them into ONE tanh + ONE select.
    over = x > max_price
    under = x < min_price
    bound = jnp.where(over, max_price, min_price)
    soft = bound + 0.3 * jnp.tanh((x - bound) * inv_scale)
    o_ref[...] = jnp.where(jnp.logical_or(over, under), soft, x)


# ----------------------------------------------------------------------------
# Pure-JAX reference (exact PyTorch math); also the tiny-shape fast path.
# ----------------------------------------------------------------------------
def _reference(x, last_close, max_change_percent=0.05):
    lc = last_close
    conf = jax.nn.sigmoid(jnp.abs(x - lc) / (lc * 0.01))
    eff = max_change_percent * (1.0 + conf)
    min_p = lc * (1.0 - eff)
    max_p = lc * (1.0 + eff)
    xc = jnp.where(x > max_p, max_p + 0.3 * jnp.tanh((x - max_p) / (lc * 0.01)), x)
    xc = jnp.where(xc < min_p, min_p + 0.3 * jnp.tanh((xc - min_p) / (lc * 0.01)), xc)
    return xc


# ----------------------------------------------------------------------------
# Wrapper helpers
# ----------------------------------------------------------------------------
def _pick_lane_width(total):
    """Largest lane-dense width (multiple of 128, <= 8192) dividing `total`."""
    t128 = total // 128
    best = 1
    for k in range(2, 65):
        if t128 % k == 0:
            best = k
    return 128 * best


def _row_tile(rows, width):
    """Row tile: ~2 MiB per block, multiple of 8, and >= 2 blocks when there are enough
    rows so a megacore ("parallel") split gives both v7x TensorCores work."""
    if rows < 16:
        return rows                                # single block == full array dim
    bytes_per_row = max(width, 1) * 4
    tr = max(8, (_TARGET_BLOCK_BYTES // bytes_per_row) // 8 * 8)
    half = max(8, ((rows + 1) // 2 + 7) // 8 * 8)  # ceil(rows/2) rounded up to mult of 8
    return min(tr, half)


# ----------------------------------------------------------------------------
# Public entry point: PriceConstraintLayer.forward
# ----------------------------------------------------------------------------
def price_constraint(x, last_close, max_change_percent=0.05, use_pallas=None):
    """Pallas implementation of PriceConstraintLayer.forward.

    x:          predictions, any shape (leading dims flattened to rows).
    last_close: broadcastable to x (typically (batch, 1) — one price per row).
    """
    x = jnp.asarray(x, jnp.float32)
    lc = jnp.asarray(last_close, jnp.float32)
    orig_shape = tuple(x.shape)

    if jnp.broadcast_shapes(lc.shape, orig_shape) != orig_shape:
        raise ValueError("last_close must be broadcastable to x without enlarging x")

    if use_pallas is None:
        use_pallas = x.size >= _MIN_PALLAS_ELEMENTS
    if not use_pallas:
        # Typical TFT-head shapes are tiny; the pallas_call launch + per-step overhead
        # would dominate, and XLA already fuses this elementwise chain.
        return _reference(x, lc, max_change_percent)

    # ---- canonical 2-D (rows, features) slab; reshapes of x / output are bitcasts ----
    if x.ndim == 0:
        x2 = x.reshape(1, 1)
    elif x.ndim == 1:
        x2 = x.reshape(1, -1)
    else:
        x2 = x.reshape(-1, orig_shape[-1])
    M, N = x2.shape
    total = M * N

    kernel = functools.partial(_price_constraint_kernel,
                               max_change_percent=float(max_change_percent))
    cparams = pltpu.CompilerParams(
        dimension_semantics=("parallel",),          # rows independent -> megacore split
        vmem_limit_bytes=_VMEM_LIMIT_BYTES,
    )

    lane_dense = (N < 128) and (total % 128 == 0)
    if lane_dense:
        # Narrow TFT-head outputs: N/128 lane utilisation would make every store a
        # masked vst.msk.  Materialise last_close at full (M, N) once in the wrapper
        # (cheap extra read) and view both operands as a lane-dense (R, Lw) slab.
        Lw = _pick_lane_width(total)
        R = total // Lw
        xin = x2.reshape(R, Lw)
        lcin = jnp.broadcast_to(lc, orig_shape).reshape(R, Lw)
        tr = _row_tile(R, Lw)
        spec = pl.BlockSpec((tr, Lw), lambda i: (i, 0))
        out = pl.pallas_call(
            kernel,
            out_shape=jax.ShapeDtypeStruct((R, Lw), jnp.float32),
            grid=(pl.cdiv(R, tr),),                 # partial last block masked — no pad
            in_specs=[spec, spec],
            out_specs=spec,
            compiler_params=cparams,
        )(xin, lcin)
    else:
        # Wide (lane-dense already) or non-repackable case: full-width row blocks,
        # last_close kept as a (M, 1) column and broadcast inside the kernel when it is
        # per-row (no (M, N) HBM materialisation).
        per_row = (lc.ndim == 0) or (lc.shape[-1] == 1)
        if per_row:
            lcin = jnp.broadcast_to(lc, orig_shape[:-1] + (1,)).reshape(M, 1)
        else:
            lcin = jnp.broadcast_to(lc, orig_shape).reshape(M, N)
        tr = _row_tile(M, N)
        x_spec = pl.BlockSpec((tr, N), lambda i: (i, 0))
        lc_spec = pl.BlockSpec((tr, lcin.shape[1]), lambda i: (i, 0))
        out = pl.pallas_call(
            kernel,
            out_shape=jax.ShapeDtypeStruct((M, N), jnp.float32),
            grid=(pl.cdiv(M, tr),),                 # partial last block masked — no pad
            in_specs=[x_spec, lc_spec],
            out_specs=x_spec,
            compiler_params=cparams,
        )(x2, lcin)

    # TODO(synk): optional bf16 output (halves write traffic) pending an accuracy sign-off.
    return out.reshape(orig_shape)


# ----------------------------------------------------------------------------
# Self-contained check
# ----------------------------------------------------------------------------
if __name__ == "__main__":
    key = jax.random.PRNGKey(0)

    def make(shape_x, shape_lc, k):
        k1, k2 = jax.random.split(k)
        lc = jax.random.uniform(k1, shape_lc, jnp.float32, 50.0, 150.0)
        x = lc + jax.random.normal(k2, shape_x, jnp.float32) * 20.0
        return x, lc

    fwd = jax.jit(price_constraint, static_argnames=("max_change_percent", "use_pallas"))

    cases = [
        ((2, 8), (2, 1)),          # tiny TFT head (forced through the Pallas kernel)
        ((64, 96), (64, 1)),       # lane-dense repack path (total % 128 == 0)
        ((4, 32, 8), (4, 1, 1)),   # 3-D broadcast of last_close
        ((520, 256), (520, 1)),    # wide-N path: 2 row blocks + masked partial block
    ]
    for shape_x, shape_lc in cases:
        key, sub = jax.random.split(key)
        x, lc = make(shape_x, shape_lc, sub)
        out = jax.block_until_ready(fwd(x, lc, use_pallas=True))
        exp = _reference(x, lc, 0.05)
        assert out.shape == x.shape, (out.shape, x.shape)
        assert bool(jnp.all(jnp.isfinite(out))), shape_x
        assert bool(jnp.allclose(out, exp, rtol=1e-5, atol=1e-4)), \
            (shape_x, float(jnp.max(jnp.abs(out - exp))))

    # Auto small-size fast path (plain jnp) also matches the reference.
    key, sub = jax.random.split(key)
    x, lc = make((2, 8), (2, 1), sub)
    out_auto = jax.block_until_ready(fwd(x, lc))
    assert bool(jnp.allclose(out_auto, _reference(x, lc, 0.05), rtol=1e-5, atol=1e-5))

    print("KERNEL_OK")
</pallas_src>

<mosaic_0001>
module attributes {stable_mosaic.version = 11 : i64} {
  func.func @_price_constraint_kernel(%arg0: i32, %arg1: memref<2x8xf32, #tpu.memory_space<vmem>>, %arg2: memref<2x1xf32, #tpu.memory_space<vmem>>, %arg3: memref<2x8xf32, #tpu.memory_space<vmem>>) attributes {dimension_semantics = [#tpu.dimension_semantics<parallel>], iteration_bounds = array<i64: 1>, scalar_prefetch = 0 : i64, scratch_operands = 0 : i64, tpu.core_type = #tpu.core_type<tc>, window_params = [{transform_indices = @transform_0, window_bounds = array<i64: 2, 8>}, {transform_indices = @transform_1, window_bounds = array<i64: 2, 1>}, {transform_indices = @transform_2, window_bounds = array<i64: 2, 8>}]} {
    %c0 = arith.constant 0 : index
    %c0_0 = arith.constant 0 : index
    %0 = vector.load %arg1[%c0, %c0_0] : memref<2x8xf32, #tpu.memory_space<vmem>>, vector<2x8xf32>
    %c0_1 = arith.constant 0 : index
    %c0_2 = arith.constant 0 : index
    %1 = vector.load %arg2[%c0_1, %c0_2] : memref<2x1xf32, #tpu.memory_space<vmem>>, vector<2x1xf32>
    %2 = vector.shape_cast %1 : vector<2x1xf32> to vector<2x1xf32>
    %3 = vector.broadcast %2 : vector<2x1xf32> to vector<2x8xf32>
    %cst = arith.constant 0.000000e+00 : f32
    %4 = vector.broadcast %cst : f32 to vector<2x8xf32>
    %5 = arith.cmpf oeq, %3, %4 : vector<2x8xf32>
    %cst_3 = arith.constant 1.000000e+00 : f32
    %6 = vector.broadcast %cst_3 : f32 to vector<2x8xf32>
    %7 = arith.select %5, %6, %3 : vector<2x8xi1>, vector<2x8xf32>
    %cst_4 = arith.constant 0.00999999977 : f32
    %8 = vector.broadcast %cst_4 : f32 to vector<2x8xf32>
    %9 = arith.mulf %7, %8 : vector<2x8xf32>
    %cst_5 = arith.constant 1.000000e+00 : f32
    %10 = vector.broadcast %cst_5 : f32 to vector<2x8xf32>
    %11 = arith.divf %10, %9 : vector<2x8xf32>
    %12 = arith.subf %0, %3 : vector<2x8xf32>
    %13 = math.absf %12 : vector<2x8xf32>
    %14 = arith.mulf %13, %11 : vector<2x8xf32>
    %cst_6 = arith.constant 5.000000e-01 : f32
    %15 = vector.broadcast %cst_6 : f32 to vector<2x8xf32>
    %16 = arith.mulf %15, %14 : vector<2x8xf32>
    %17 = math.tanh %16 : vector<2x8xf32>
    %cst_7 = arith.constant 1.000000e+00 : f32
    %18 = vector.broadcast %cst_7 : f32 to vector<2x8xf32>
    %19 = arith.addf %18, %17 : vector<2x8xf32>
    %cst_8 = arith.constant 5.000000e-01 : f32
    %20 = vector.broadcast %cst_8 : f32 to vector<2x8xf32>
    %21 = arith.mulf %20, %19 : vector<2x8xf32>
    %cst_9 = arith.constant 1.000000e+00 : f32
    %22 = vector.broadcast %cst_9 : f32 to vector<2x8xf32>
    %23 = arith.addf %22, %21 : vector<2x8xf32>
    %cst_10 = arith.constant 5.000000e-02 : f32
    %24 = vector.broadcast %cst_10 : f32 to vector<2x8xf32>
    %25 = arith.mulf %24, %23 : vector<2x8xf32>
    %26 = arith.mulf %3, %25 : vector<2x8xf32>
    %27 = arith.addf %3, %26 : vector<2x8xf32>
    %28 = arith.subf %3, %26 : vector<2x8xf32>
    %29 = arith.cmpf ogt, %0, %27 : vector<2x8xf32>
    %30 = arith.cmpf olt, %0, %28 : vector<2x8xf32>
    %31 = arith.select %29, %27, %28 : vector<2x8xi1>, vector<2x8xf32>
    %32 = arith.subf %0, %31 : vector<2x8xf32>
    %33 = arith.mulf %32, %11 : vector<2x8xf32>
    %34 = math.tanh %33 : vector<2x8xf32>
    %cst_11 = arith.constant 3.000000e-01 : f32
    %35 = vector.broadcast %cst_11 : f32 to vector<2x8xf32>
    %36 = arith.mulf %35, %34 : vector<2x8xf32>
    %37 = arith.addf %31, %36 : vector<2x8xf32>
    %38 = arith.ori %29, %30 : vector<2x8xi1>
    %39 = arith.select %38, %37, %0 : vector<2x8xi1>, vector<2x8xf32>
    %c0_12 = arith.constant 0 : index
    %c0_13 = arith.constant 0 : index
    %40 = vector.load %arg3[%c0_12, %c0_13] : memref<2x8xf32, #tpu.memory_space<vmem>>, vector<2x8xf32>
    tpu.vector_store %arg3[%c0_12, %c0_13], %39 {strides = array<i32>} : memref<2x8xf32, #tpu.memory_space<vmem>>, vector<2x8xf32>,
    return
  }
  func.func @transform_0(%arg0: i32) -> (i32, i32) {
    %c0_i32 = arith.constant 0 : i32
    %c0_i32_0 = arith.constant 0 : i32
    return %arg0, %c0_i32 : i32, i32
  }
  func.func @transform_1(%arg0: i32) -> (i32, i32) {
    %c0_i32 = arith.constant 0 : i32
    %c0_i32_0 = arith.constant 0 : i32
    return %arg0, %c0_i32 : i32, i32
  }
  func.func @transform_2(%arg0: i32) -> (i32, i32) {
    %c0_i32 = arith.constant 0 : i32
    %c0_i32_0 = arith.constant 0 : i32
    return %arg0, %c0_i32 : i32, i32
  }
}

</mosaic_0001>

<bundles_post_ra>
// kernel: price_constraint.1
= control target key start
LH: loop header
LB: loop body
LE: loop exit
PB: predicated region body
PF: predicated region fallthrough
CT: control target
= control target key end

     0   :  { %s130_s0 = inlined_call_operand.vmem [shape: f32[2,8], index: 0, kind: input, shape index: {}]   ;;  %s131_s1 = inlined_call_operand.vmem [shape: f32[2,1], index: 1, kind: input, shape index: {}]   ;;  %s132_s2 = inlined_call_operand.hbm [shape: f32[2,8], index: 2, kind: output, shape index: {}]  }
   0x1   :  { %v13_v0 = vld [vmem:[%s131_s1] sm:$0x3] }
   0x2   :  { %7 = vsyncpa [#allocation3], 0  ;;  %v95_v1 = vmov 0   ;;  %v12_v5 = vld [vmem:[%s130_s0] sm:$0x3]  ;;  %s96_s0 = smov [#allocation2]  }
   0x3   :  { %64 = vset.pattern.permute.xlu0 %v95_v1  ;;  %s54_s1 = sshll.u32 %s96_s0, 4  ;;  %vm46_vm3 = vcmask 58368   ;;  %s55_s1 = int_to_ptr.vmem [resolvable:$true] %s54_s1 }
   0x4   :  { %16 = vperm.xlu0 %64, %v13_v0   ;;  %s71_s13 = scalar_lea.vmem %s55_s1, 32  ;;  %p76_p1 = scmp.lt.s32.totalorder %s55_s1, %s55_s1 }
   0x5   :  { %p72_p0 = scmp.ne.s32.totalorder %s55_s1, %s71_s13  ;;  %p77_p2 = scmp.lt.s32.totalorder %s71_s13, %s71_s13 }
   0x7   :  { %p78_p3 = por %p77_p2, %p76_p1 }
   0x9   :  { %p79_p4 = pnand %p78_p3, %p72_p0 }
  0x83   :  { %v17_v2 = vpop.permute.xlu0 %16 }
  0x84   :  { %vm19_vm0 = vcmp.eq.f32.partialorder %v17_v2, 0.0  ;;  %v24_v6 = vsub.f32 %v12_v5, %v17_v2 }
  0x85   :  { %v20_v3 = vsel %vm19_vm0, 1.0, %v17_v2 }
  0x86   :  { %v21_v4 = vmul.f32 0.01, %v20_v3  ;;  %v25_v7 = vand.u32 2147483647, %v24_v6 }
  0x88   :  { %65 = vrcp.f32 %v21_v4 }
  0x92   :  { %v66_v8 = vpop.eup %65 }
  0x93   :  { %v26_v9 = vmul.f32 %v66_v8, %v25_v7 }
  0x95   :  { %v27_v10 = vmul.f32 0.5, %v26_v9 }
  0x97   :  { %67 = vtanh.f32 %v27_v10 }
  0xa1   :  { %v68_v11 = vpop.eup %67 }
  0xa2   :  { %v29_v12 = vadd.f32 1.0, %v68_v11 }
  0xa4   :  { %v30_v13 = vmul.f32 0.5, %v29_v12 }
  0xa6   :  { %v31_v14 = vadd.f32 1.0, %v30_v13 }
  0xa8   :  { %v32_v15 = vmul.f32 0.05, %v31_v14 }
  0xaa   :  { %v33_v16 = vmul.f32 %v32_v15, %v17_v2 }
  0xac   :  { %v34_v17 = vadd.f32 %v33_v16, %v17_v2  ;;  %v35_v18 = vsub.f32 %v17_v2, %v33_v16 }
  0xae   :  { %vm36_vm1 = vcmp.gt.f32.partialorder %v12_v5, %v34_v17  ;;  %vm37_vm2 = vcmp.lt.f32.partialorder %v12_v5, %v35_v18 }
  0xaf   :  { %v38_v19 = vsel %vm36_vm1, %v34_v17, %v35_v18  ;;  %vm44_vm4 = vmor %vm36_vm1, %vm37_vm2 }
  0xb0   :  { %v39_v20 = vsub.f32 %v12_v5, %v38_v19 }
  0xb2   :  { %v40_v21 = vmul.f32 %v66_v8, %v39_v20 }
  0xb4   :  { %69 = vtanh.f32 %v40_v21 }
  0xbe   :  { %v70_v22 = vpop.eup %69 }
  0xbf   :  { %v42_v23 = vmul.f32 0.3, %v70_v22 }
  0xc1   :  { %v43_v24 = vadd.f32 %v42_v23, %v38_v19 }
  0xc3   :  { %v45_v25 = vsel %vm44_vm4, %v43_v24, %v12_v5 }
  0xc4   :  { %47 = vst.msk [vmem:[#allocation2] sm:$0x3] %vm46_vm3, %v45_v25 }
  0xc5   :  { %82 = shalt.err (!%p79_p4)
}
  0xc6   :  { %s83_s16 = scalar_lea.hbm %s132_s2, 32 }
  0xc7   :  { %p84_p5 = scmp.ne.s32.totalorder %s132_s2, %s83_s16  ;;  %p87_p6 = scmp.lt.u32.totalorder %s83_s16, %s132_s2 }
  0xc9   :  { %p89_p7 = pnand %p87_p6, %p84_p5 }
  0xcb   :  { %92 = shalt.err (!%p89_p7)
}
  0xcc   :  { %57 = dma.vmem_to_hbm [thread:$0]  %s55_s1, 32, %s132_s2, [#allocation3]  }
  0xcd   :  { %93 = dma.done.wait [#allocation3], 32  }
  0xce   :  { %94 = vsyncadd [#allocation3], 4294967264 }
  0xcf   :  { %61 = vsyncpa [#allocation3], 1 }

</bundles_post_ra>
